<compile_context>
chip_gen: v7x
topology: tpu7x:2x2x1
jax: 0.10.0
libtpu: 0.0.40
codegen_flags: <defaults>
</compile_context>

<pallas_src>
import jax
import jax.numpy as jnp
from jax.experimental import pallas as pl
from jax.experimental.pallas import tpu as pltpu

IN_DIM, H1, H2, OUT_DIM = 6, 64, 16, 3
OUT_PAD = 8   # output layer padded to one full sublane group


def _round_up(n, m):
    return ((n + m - 1) // m) * m


def policy_kernel(x_ref, w1_ref, b1_ref, w2_ref, b2_ref, w3_ref, b3_ref, o_ref):
    # x_ref: (TB, IN_DIM) batch-major tile straight from HBM.  Flip it to
    # feature-major inside the kernel so every activation is lane-dense
    # (batch on the 128-lane axis).
    x_fm = x_ref[...].T                                           # (IN_DIM, TB)

    # ---- Layer 1: Linear(6 -> 64) + ReLU (MXU; Mosaic pads K=6) -------------
    h1 = jnp.dot(w1_ref[...], x_fm, preferred_element_type=jnp.float32)
    h1 = jnp.maximum(h1 + b1_ref[...], 0.0)                       # (H1, TB)

    # ---- Layer 2: Linear(64 -> 16) + ReLU (bf16 MXU operands, f32 acc) ------
    h2 = jnp.dot(w2_ref[...].astype(jnp.bfloat16),
                 h1.astype(jnp.bfloat16),
                 preferred_element_type=jnp.float32)
    h2 = jnp.maximum(h2 + b2_ref[...], 0.0)                       # (H2, TB)

    # ---- Layer 3: Linear(16 -> 3) (+5 zero pad rows) + softmax over features
    logits = jnp.dot(w3_ref[...], h2, preferred_element_type=jnp.float32)
    logits = logits + b3_ref[...]                                 # (OUT_PAD, TB)

    # 3-way softmax with explicit row slices (no cross-lane reduce).  Exact
    # division so each row sums to 1 to f32 precision.
    l0, l1, l2 = logits[0:1, :], logits[1:2, :], logits[2:3, :]
    m = jnp.maximum(jnp.maximum(l0, l1), l2)                      # (1, TB)
    e = jnp.exp(logits - m)                                       # rows 3..7 junk, never used
    denom = e[0:1, :] + e[1:2, :] + e[2:3, :]
    probs = e / denom                                             # (OUT_PAD, TB)

    # Batch-major store: aligned (8, TB) -> (TB, 8) transpose, keep 3 real cols.
    o_ref[...] = probs.T[:, :OUT_DIM]


def _pick_tile(B, tb_cap):
    """Batch tile: big enough to amortize ~0.35us/grid-step; >= 2 grid steps
    once B >= 256 so v7x's two TensorCores both get work."""
    tb_cap = max(128, _round_up(tb_cap, 128))
    if B < 256:
        return _round_up(max(B, 8), 8)          # one small tile
    return min(tb_cap, _round_up(pl.cdiv(B, 2), 128))


def policy_network_forward(x, params, *, tb=4096):
    """Forward pass. x: (B, IN_DIM) float32 -> (B, OUT_DIM) softmax probs."""
    w1, b1, w2, b2, w3, b3 = params
    B = x.shape[0]
    x = x.astype(jnp.float32)

    # Tiny (<100 B) pads so the output layer fills a sublane group; not on the
    # batch data path.
    w3p = jnp.pad(w3.astype(jnp.float32), ((0, OUT_PAD - OUT_DIM), (0, 0)))
    b3p = jnp.pad(b3.astype(jnp.float32), ((0, OUT_PAD - OUT_DIM), (0, 0)))

    TB = _pick_tile(B, tb)
    grid_b = pl.cdiv(B, TB)

    resident = lambda a: pl.BlockSpec(a.shape, lambda i: (0, 0))

    # TODO(synk): pack the six resident weight/bias operands into one VMEM
    # operand to shave six tiny prologue DMAs (minor latency win only).
    n_param = IN_DIM * H1 + H1 + H1 * H2 + H2 + H2 * OUT_DIM + OUT_DIM
    cost = pl.CostEstimate(
        flops=2 * B * (IN_DIM * H1 + H1 * H2 + H2 * OUT_DIM),
        transcendentals=OUT_DIM * B,
        bytes_accessed=4 * (B * (IN_DIM + OUT_DIM) + n_param),
    )

    return pl.pallas_call(
        policy_kernel,
        out_shape=jax.ShapeDtypeStruct((B, OUT_DIM), jnp.float32),
        grid=(grid_b,),
        in_specs=[
            pl.BlockSpec((TB, IN_DIM), lambda i: (i, 0)),   # streamed batch tiles
            resident(w1), resident(b1),
            resident(w2), resident(b2),
            resident(w3p), resident(b3p),
        ],
        out_specs=pl.BlockSpec((TB, OUT_DIM), lambda i: (i, 0)),
        compiler_params=pltpu.CompilerParams(
            dimension_semantics=("parallel",),   # independent batch tiles
        ),
        cost_estimate=cost,
    )(x, w1, b1, w2, b2, w3p, b3p)


def init_params(key):
    """PyTorch-layout params: w (out, in), b (out, 1); U(-1/sqrt(fan_in), 1/sqrt(fan_in))."""
    ks = jax.random.split(key, 6)

    def linear(kw, kb, fan_in, fan_out):
        bound = 1.0 / jnp.sqrt(fan_in)
        w = jax.random.uniform(kw, (fan_out, fan_in), jnp.float32, -bound, bound)
        b = jax.random.uniform(kb, (fan_out, 1), jnp.float32, -bound, bound)
        return w, b

    w1, b1 = linear(ks[0], ks[1], IN_DIM, H1)
    w2, b2 = linear(ks[2], ks[3], H1, H2)
    w3, b3 = linear(ks[4], ks[5], H2, OUT_DIM)
    return (w1, b1, w2, b2, w3, b3)


def policy_reference(x, params):
    """Pure-JAX reference matching the PyTorch module."""
    w1, b1, w2, b2, w3, b3 = params
    h1 = jax.nn.relu(x @ w1.T + b1[:, 0])
    h2 = jax.nn.relu(h1 @ w2.T + b2[:, 0])
    return jax.nn.softmax(h2 @ w3.T + b3[:, 0], axis=-1)


if __name__ == "__main__":
    key = jax.random.PRNGKey(0)
    k_params, k_x, k_x2 = jax.random.split(key, 3)

    params = init_params(k_params)

    # Small batch (single 8-row tile), state dim = 6.
    batch = 8
    x = jax.random.normal(k_x, (batch, IN_DIM), jnp.float32)
    out = jax.block_until_ready(policy_network_forward(x, params))
    assert out.shape == (batch, OUT_DIM)
    assert jnp.allclose(jnp.sum(out, axis=-1), 1.0, atol=1e-5)
    assert jnp.allclose(out, policy_reference(x, params), atol=2e-3)

    # Multi-tile path with a partial last tile (2 tiles of 256 over 300 rows).
    batch2 = 300
    x2 = jax.random.normal(k_x2, (batch2, IN_DIM), jnp.float32)
    out2 = jax.block_until_ready(policy_network_forward(x2, params))
    assert out2.shape == (batch2, OUT_DIM)
    assert jnp.allclose(jnp.sum(out2, axis=-1), 1.0, atol=1e-5)
    assert jnp.allclose(out2, policy_reference(x2, params), atol=2e-3)

    print("KERNEL_OK")
</pallas_src>

<mosaic_0001>
module attributes {stable_mosaic.version = 11 : i64} {
  func.func @policy_kernel(%arg0: i32, %arg1: memref<8x6xf32, #tpu.memory_space<vmem>>, %arg2: memref<64x6xf32, #tpu.memory_space<vmem>>, %arg3: memref<64x1xf32, #tpu.memory_space<vmem>>, %arg4: memref<16x64xf32, #tpu.memory_space<vmem>>, %arg5: memref<16x1xf32, #tpu.memory_space<vmem>>, %arg6: memref<8x16xf32, #tpu.memory_space<vmem>>, %arg7: memref<8x1xf32, #tpu.memory_space<vmem>>, %arg8: memref<8x3xf32, #tpu.memory_space<vmem>>) attributes {dimension_semantics = [#tpu.dimension_semantics<parallel>], iteration_bounds = array<i64: 1>, scalar_prefetch = 0 : i64, scratch_operands = 0 : i64, tpu.core_type = #tpu.core_type<tc>, window_params = [{transform_indices = @transform_0, window_bounds = array<i64: 8, 6>}, {pipeline_mode = #tpu.pipeline_mode<synchronous>, transform_indices = @transform_1, window_bounds = array<i64: 64, 6>}, {pipeline_mode = #tpu.pipeline_mode<synchronous>, transform_indices = @transform_2, window_bounds = array<i64: 64, 1>}, {pipeline_mode = #tpu.pipeline_mode<synchronous>, transform_indices = @transform_3, window_bounds = array<i64: 16, 64>}, {pipeline_mode = #tpu.pipeline_mode<synchronous>, transform_indices = @transform_4, window_bounds = array<i64: 16, 1>}, {pipeline_mode = #tpu.pipeline_mode<synchronous>, transform_indices = @transform_5, window_bounds = array<i64: 8, 16>}, {pipeline_mode = #tpu.pipeline_mode<synchronous>, transform_indices = @transform_6, window_bounds = array<i64: 8, 1>}, {transform_indices = @transform_7, window_bounds = array<i64: 8, 3>}]} {
    %c0 = arith.constant 0 : index
    %c0_0 = arith.constant 0 : index
    %0 = vector.load %arg1[%c0, %c0_0] : memref<8x6xf32, #tpu.memory_space<vmem>>, vector<8x6xf32>
    %1 = tpu.transpose %0, [1, 0] : vector<8x6xf32> -> vector<6x8xf32>
    %c0_1 = arith.constant 0 : index
    %c0_2 = arith.constant 0 : index
    %2 = vector.load %arg2[%c0_1, %c0_2] : memref<64x6xf32, #tpu.memory_space<vmem>>, vector<64x6xf32>
    %cst = arith.constant dense<0.000000e+00> : vector<64x8xf32>
    %3 = tpu.matmul %2, %1, %cst {dimension_numbers = #tpu.dot_dimension_numbers<[1], [0], [0], [1], [0, 0, 1, 1], [], []>} : vector<64x6xf32>, vector<6x8xf32>, vector<64x8xf32> -> vector<64x8xf32>
    %c0_3 = arith.constant 0 : index
    %c0_4 = arith.constant 0 : index
    %4 = vector.load %arg3[%c0_3, %c0_4] : memref<64x1xf32, #tpu.memory_space<vmem>>, vector<64x1xf32>
    %5 = vector.broadcast %4 : vector<64x1xf32> to vector<64x8xf32>
    %6 = arith.addf %3, %5 : vector<64x8xf32>
    %cst_5 = arith.constant 0.000000e+00 : f32
    %7 = vector.broadcast %cst_5 : f32 to vector<64x8xf32>
    %8 = arith.maximumf %6, %7 : vector<64x8xf32>
    %c0_6 = arith.constant 0 : index
    %c0_7 = arith.constant 0 : index
    %9 = vector.load %arg4[%c0_6, %c0_7] : memref<16x64xf32, #tpu.memory_space<vmem>>, vector<16x64xf32>
    %10 = arith.truncf %9 : vector<16x64xf32> to vector<16x64xbf16>
    %11 = arith.truncf %8 : vector<64x8xf32> to vector<64x8xbf16>
    %cst_8 = arith.constant dense<0.000000e+00> : vector<16x8xf32>
    %12 = tpu.matmul %10, %11, %cst_8 {dimension_numbers = #tpu.dot_dimension_numbers<[1], [0], [0], [1], [0, 0, 1, 1], [], []>} : vector<16x64xbf16>, vector<64x8xbf16>, vector<16x8xf32> -> vector<16x8xf32>
    %c0_9 = arith.constant 0 : index
    %c0_10 = arith.constant 0 : index
    %13 = vector.load %arg5[%c0_9, %c0_10] : memref<16x1xf32, #tpu.memory_space<vmem>>, vector<16x1xf32>
    %14 = vector.broadcast %13 : vector<16x1xf32> to vector<16x8xf32>
    %15 = arith.addf %12, %14 : vector<16x8xf32>
    %cst_11 = arith.constant 0.000000e+00 : f32
    %16 = vector.broadcast %cst_11 : f32 to vector<16x8xf32>
    %17 = arith.maximumf %15, %16 : vector<16x8xf32>
    %c0_12 = arith.constant 0 : index
    %c0_13 = arith.constant 0 : index
    %18 = vector.load %arg6[%c0_12, %c0_13] : memref<8x16xf32, #tpu.memory_space<vmem>>, vector<8x16xf32>
    %cst_14 = arith.constant dense<0.000000e+00> : vector<8x8xf32>
    %19 = tpu.matmul %18, %17, %cst_14 {dimension_numbers = #tpu.dot_dimension_numbers<[1], [0], [0], [1], [0, 0, 1, 1], [], []>} : vector<8x16xf32>, vector<16x8xf32>, vector<8x8xf32> -> vector<8x8xf32>
    %c0_15 = arith.constant 0 : index
    %c0_16 = arith.constant 0 : index
    %20 = vector.load %arg7[%c0_15, %c0_16] : memref<8x1xf32, #tpu.memory_space<vmem>>, vector<8x1xf32>
    %21 = vector.broadcast %20 : vector<8x1xf32> to vector<8x8xf32>
    %22 = arith.addf %19, %21 : vector<8x8xf32>
    %23 = vector.extract_strided_slice %22 {offsets = [0, 0], sizes = [1, 8], strides = [1, 1]} : vector<8x8xf32> to vector<1x8xf32>
    %24 = vector.extract_strided_slice %22 {offsets = [1, 0], sizes = [1, 8], strides = [1, 1]} : vector<8x8xf32> to vector<1x8xf32>
    %25 = vector.extract_strided_slice %22 {offsets = [2, 0], sizes = [1, 8], strides = [1, 1]} : vector<8x8xf32> to vector<1x8xf32>
    %26 = arith.maximumf %23, %24 : vector<1x8xf32>
    %27 = arith.maximumf %26, %25 : vector<1x8xf32>
    %28 = vector.broadcast %27 : vector<1x8xf32> to vector<8x8xf32>
    %29 = arith.subf %22, %28 : vector<8x8xf32>
    %30 = math.exp %29 : vector<8x8xf32>
    %31 = vector.extract_strided_slice %30 {offsets = [0, 0], sizes = [1, 8], strides = [1, 1]} : vector<8x8xf32> to vector<1x8xf32>
    %32 = vector.extract_strided_slice %30 {offsets = [1, 0], sizes = [1, 8], strides = [1, 1]} : vector<8x8xf32> to vector<1x8xf32>
    %33 = arith.addf %31, %32 : vector<1x8xf32>
    %34 = vector.extract_strided_slice %30 {offsets = [2, 0], sizes = [1, 8], strides = [1, 1]} : vector<8x8xf32> to vector<1x8xf32>
    %35 = arith.addf %33, %34 : vector<1x8xf32>
    %36 = vector.broadcast %35 : vector<1x8xf32> to vector<8x8xf32>
    %37 = arith.divf %30, %36 : vector<8x8xf32>
    %38 = tpu.transpose %37, [1, 0] : vector<8x8xf32> -> vector<8x8xf32>
    %39 = vector.extract_strided_slice %38 {offsets = [0, 0], sizes = [8, 3], strides = [1, 1]} : vector<8x8xf32> to vector<8x3xf32>
    %c0_17 = arith.constant 0 : index
    %c0_18 = arith.constant 0 : index
    %40 = vector.load %arg8[%c0_17, %c0_18] : memref<8x3xf32, #tpu.memory_space<vmem>>, vector<8x3xf32>
    tpu.vector_store %arg8[%c0_17, %c0_18], %39 {strides = array<i32>} : memref<8x3xf32, #tpu.memory_space<vmem>>, vector<8x3xf32>,
    return
  }
  func.func @transform_0(%arg0: i32) -> (i32, i32) {
    %c0_i32 = arith.constant 0 : i32
    %c0_i32_0 = arith.constant 0 : i32
    return %arg0, %c0_i32 : i32, i32
  }
  func.func @transform_1(%arg0: i32) -> (i32, i32) {
    %c0_i32 = arith.constant 0 : i32
    %c0_i32_0 = arith.constant 0 : i32
    %c0_i32_1 = arith.constant 0 : i32
    return %c0_i32, %c0_i32_0 : i32, i32
  }
  func.func @transform_2(%arg0: i32) -> (i32, i32) {
    %c0_i32 = arith.constant 0 : i32
    %c0_i32_0 = arith.constant 0 : i32
    %c0_i32_1 = arith.constant 0 : i32
    return %c0_i32, %c0_i32_0 : i32, i32
  }
  func.func @transform_3(%arg0: i32) -> (i32, i32) {
    %c0_i32 = arith.constant 0 : i32
    %c0_i32_0 = arith.constant 0 : i32
    %c0_i32_1 = arith.constant 0 : i32
    return %c0_i32, %c0_i32_0 : i32, i32
  }
  func.func @transform_4(%arg0: i32) -> (i32, i32) {
    %c0_i32 = arith.constant 0 : i32
    %c0_i32_0 = arith.constant 0 : i32
    %c0_i32_1 = arith.constant 0 : i32
    return %c0_i32, %c0_i32_0 : i32, i32
  }
  func.func @transform_5(%arg0: i32) -> (i32, i32) {
    %c0_i32 = arith.constant 0 : i32
    %c0_i32_0 = arith.constant 0 : i32
    %c0_i32_1 = arith.constant 0 : i32
    return %c0_i32, %c0_i32_0 : i32, i32
  }
  func.func @transform_6(%arg0: i32) -> (i32, i32) {
    %c0_i32 = arith.constant 0 : i32
    %c0_i32_0 = arith.constant 0 : i32
    %c0_i32_1 = arith.constant 0 : i32
    return %c0_i32, %c0_i32_0 : i32, i32
  }
  func.func @transform_7(%arg0: i32) -> (i32, i32) {
    %c0_i32 = arith.constant 0 : i32
    %c0_i32_0 = arith.constant 0 : i32
    return %arg0, %c0_i32 : i32, i32
  }
}

</mosaic_0001>

<bundles_post_ra>
// kernel: tpu_custom_call.1
= control target key start
LH: loop header
LB: loop body
LE: loop exit
PB: predicated region body
PF: predicated region fallthrough
CT: control target
= control target key end

     0   :  { %vm84_vm0 = vcmask 48128   ;;  %v511_v2 = vmov 0   ;;  %v512_v21 = vmov 0.0   ;;  %vm513_vm1 = vmmov 0   ;;  %s637_s0 = inlined_call_operand.vmem [shape: f32[8,6], index: 0, kind: input, shape index: {}]   ;;  %s638_s1 = inlined_call_operand.vmem [shape: f32[64,6], index: 1, kind: input, shape index: {}]   ;;  %s639_s2 = inlined_call_operand.vmem [shape: f32[64,1], index: 2, kind: input, shape index: {}]   ;;  %s640_s4 = inlined_call_operand.vmem [shape: f32[16,1], index: 4, kind: input, shape index: {}]   ;;  %s641_s6 = inlined_call_operand.vmem [shape: f32[8,1], index: 6, kind: input, shape index: {}]   ;;  %s642_s3 = inlined_call_operand.vmem [shape: f32[16,64], index: 3, kind: input, shape index: {}]   ;;  %s643_s5 = inlined_call_operand.vmem [shape: f32[8,16], index: 5, kind: input, shape index: {}]   ;;  %s644_s7 = inlined_call_operand.vmem [shape: f32[8,3], index: 7, kind: output, shape index: {}]  }
   0x1   :  { %v27_v0 = vld [vmem:[%s637_s0] sm:$0xff]  ;;  %505 = vset.pattern.permute.xlu0 %v511_v2  ;;  %506 = vset.pattern.permute.xlu1 %v511_v2  ;;  %v29_v3 = vld [vmem:[%s638_s1 + $0x8] sm:$0xff]  ;;  %v30_v4 = vld [vmem:[%s638_s1 + $0x10] sm:$0xff]  ;;  %vm244_vm2 = vcmask 523264   ;;  %v514_v61 = vmov 0.0|0.0   ;;  %vm298_vm3 = vcmask 130048  }
   0x2   :  { %v28_v1 = vld [vmem:[%s638_s1] sm:$0xff]  ;;  %465 = vmatprep.subr.msk.mxu0 %vm84_vm0, %v27_v0  ;;  %v38_v6 = vld [vmem:[%s639_s2 + $0x10] sm:$0xff]  ;;  %v37_v7 = vld [vmem:[%s639_s2 + $0x8] sm:$0xff]  ;;  %479 = vmatprep.subr.bf16.mxu1 %v512_v21  ;;  %vm431_vm4 = vcmask 23552  }
   0x3   :  { %467 = vmatprep.mubr.msk.f32.mxu0 %vm84_vm0, %v28_v1  ;;  %466 = vmatpush3.xpose.msk.msra.mxu0 %vm84_vm0, %v27_v0  ;;  %v36_v5 = vld [vmem:[%s639_s2] sm:$0xff]  ;;  %v39_v8 = vld [vmem:[%s639_s2 + $0x18] sm:$0xff]  ;;  %v41_v12 = vld [vmem:[%s639_s2 + $0x28] sm:$0xff] }
   0x4   :  { %46 = vperm.xlu0 %505, %v36_v5   ;;  %56 = vperm.xlu1 %506, %v38_v6   ;;  %v31_v9 = vld [vmem:[%s638_s1 + $0x18] sm:$0xff]  ;;  %v32_v10 = vld [vmem:[%s638_s1 + $0x20] sm:$0xff]  ;;  %v33_v13 = vld [vmem:[%s638_s1 + $0x28] sm:$0xff] }
   0x5   :  { %v40_v11 = vld [vmem:[%s639_s2 + $0x20] sm:$0xff]  ;;  %v34_v14 = vld [vmem:[%s638_s1 + $0x30] sm:$0xff]  ;;  %v43_v16 = vld [vmem:[%s639_s2 + $0x38] sm:$0xff]  ;;  %487 = vmatprep.mubr.msk.bf16.mxu1 %vm513_vm1, %v512_v21  ;;  %498 = vmatprep.subr.bf16.mxu0 %v514_v61 }
   0x6   :  { %468 = vmatmul.mubr.msk.f32.vlgmr.msra.gmra.mrb[0].mxu0 %vm84_vm0, %v29_v3  ;;  %v42_v15 = vld [vmem:[%s639_s2 + $0x30] sm:$0xff]  ;;  %v35_v17 = vld [vmem:[%s638_s1 + $0x38] sm:$0xff]  ;;  %v232_v18 = vld [vmem:[%s640_s4] sm:$0xff] }
   0x7   :  { %470 = vmatprep.mubr.msk.f32.mxu0 %vm84_vm0, %v30_v4  ;;  %v233_v19 = vld [vmem:[%s640_s4 + $0x8] sm:$0xff]  ;;  %v292_v20 = vld [vmem:[%s641_s6] sm:$0xff] }
   0x8   :  { %51 = vperm.xlu0 %505, %v37_v7   ;;  %61 = vperm.xlu1 %506, %v39_v8   ;;  %v225_v57 = vld [vmem:[%s642_s3] sm:$0xff]  ;;  %v226_v58 = vld [vmem:[%s642_s3 + $0x8] sm:$0xff] }
   0x9   :  { %v227_v60 = vpack.c.bf16 %v226_v58, %v225_v57 }
   0xa   :  { %471 = vmatmul.mubr.msk.f32.gmra.mrb[2].mxu0 %vm84_vm0, %v31_v9  ;;  %v291_v9 = vld [vmem:[%s643_s5] sm:$0xff] }
   0xb   :  { %473 = vmatprep.mubr.msk.f32.mxu0 %vm84_vm0, %v32_v10  ;;  %v379_v10 = vlaneseq }
   0xc   :  { %66 = vperm.xlu0 %505, %v40_v11   ;;  %71 = vperm.xlu1 %506, %v41_v12  }
   0xe   :  { %474 = vmatmul.mubr.msk.f32.gmra.mrb[4].mxu0 %vm84_vm0, %v33_v13 }
   0xf   :  { %476 = vmatprep.mubr.msk.f32.mxu0 %vm84_vm0, %v34_v14  ;;  %v380_v14 = vshrl.u32 %v379_v10, 7 }
  0x10   :  { %76 = vperm.xlu0 %505, %v42_v15   ;;  %81 = vperm.xlu1 %506, %v43_v16  }
  0x12   :  { %477 = vmatmul.mubr.msk.f32.gmra.mrb[6].mxu0 %vm84_vm0, %v35_v17 }
  0x13   :  { %495 = vmatprep.mubr.msk.f32.mxu0 %vm513_vm1, %v512_v21 }
  0x14   :  { %236 = vperm.xlu0 %505, %v232_v18   ;;  %241 = vperm.xlu1 %506, %v233_v19   ;;  %v381_v19 = vsub.s32 0, %v380_v14 }
  0x18   :  { %295 = vperm.xlu0 %505, %v292_v20  }
  0x83   :  { %v47_v22 = vpop.permute.xlu0 %46  ;;  %v57_v23 = vpop.permute.xlu1 %56 }
  0x87   :  { %v52_v24 = vpop.permute.xlu0 %51  ;;  %v62_v25 = vpop.permute.xlu1 %61 }
  0x8b   :  { %v72_v35 = vpop.permute.xlu1 %71  ;;  %v67_v38 = vpop.permute.xlu0 %66 }
  0x8f   :  { %v82_v47 = vpop.permute.xlu1 %81  ;;  %v77_v50 = vpop.permute.xlu0 %76 }
  0x93   :  { %v237_v62 = vpop.permute.xlu0 %236  ;;  %v242_v2 = vpop.permute.xlu1 %241 }
  0x97   :  { %v296_v11 = vpop.permute.xlu0 %295 }
  0xd9   :  { %v469_v26 = vpop.f32.mrb[0].mxu0 }
  0xda   :  { %v184_v27 = vadd.f32 %v469_v26, %v52_v24  ;;  %v178_v28 = vpop.f32.mrb[1].mxu0 }
  0xdb   :  { %v179_v29 = vadd.f32 %v178_v28, %v47_v22 }
  0xdc   :  { %v218_v30 = vmax.f32 %v184_v27, 0.0 }
  0xdd   :  { %v217_v31 = vmax.f32 %v179_v29, 0.0  ;;  %v472_v32 = vpop.f32.mrb[2].mxu0 }
  0xde   :  { %v194_v33 = vadd.f32 %v472_v32, %v62_v25  ;;  %v188_v34 = vpop.f32.mrb[3].mxu0 }
  0xdf   :  { %v189_v36 = vadd.f32 %v188_v34, %v57_v23  ;;  %v228_v37 = vpack.c.bf16 %v218_v30, %v217_v31 }
  0xe0   :  { %v220_v39 = vmax.f32 %v194_v33, 0.0 }
  0xe1   :  { %v219_v40 = vmax.f32 %v189_v36, 0.0  ;;  %v475_v41 = vpop.f32.mrb[4].mxu0  ;;  %480 = vmatpush3.bf16.msra.mxu1 %v228_v37 }
  0xe2   :  { %v204_v42 = vadd.f32 %v475_v41, %v72_v35  ;;  %v198_v43 = vpop.f32.mrb[5].mxu0  ;;  %481 = vmatprep.subr.bf16.mxu1 %v512_v21 }
  0xe3   :  { %v229_v44 = vpack.c.bf16 %v220_v39, %v219_v40  ;;  %v199_v45 = vadd.f32 %v198_v43, %v67_v38 }
  0xe4   :  { %v222_v46 = vmax.f32 %v204_v42, 0.0 }
  0xe5   :  { %v221_v48 = vmax.f32 %v199_v45, 0.0  ;;  %v478_v49 = vpop.f32.mrb[6].mxu0  ;;  %482 = vmatpush3.bf16.msra.mxu1 %v229_v44 }
  0xe6   :  { %v214_v51 = vadd.f32 %v478_v49, %v82_v47  ;;  %v208_v52 = vpop.f32.mrb[7].mxu0  ;;  %483 = vmatprep.subr.bf16.mxu1 %v512_v21 }
  0xe7   :  { %v230_v53 = vpack.c.bf16 %v222_v46, %v221_v48  ;;  %v209_v54 = vadd.f32 %v208_v52, %v77_v50 }
  0xe8   :  { %v224_v55 = vmax.f32 %v214_v51, 0.0 }
  0xe9   :  { %v223_v56 = vmax.f32 %v209_v54, 0.0  ;;  %484 = vmatpush3.bf16.msra.mxu1 %v230_v53 }
  0xea   :  { %485 = vmatprep.subr.bf16.mxu1 %v512_v21 }
  0xeb   :  { %v231_v59 = vpack.c.bf16 %v224_v55, %v223_v56 }
  0xed   :  { %486 = vmatpush3.bf16.msra.mxu1 %v231_v59 }
  0xf0   :  { %488 = vmatmul.mubr.msk.bf16.vlgmr.msra.gmra.mrb[0].mxu1 %vm244_vm2, %v227_v60 }
 0x1c3   :  { %v282_v63 = vpop.f32.mrb[0].mxu1 }
 0x1c4   :  { %v283_v0 = vadd.f32 %v282_v63, %v237_v62  ;;  %v489_v1 = vpop.f32.mrb[1].mxu1 }
 0x1c5   :  { %v285_v3 = vpop.f32.mrb[2].mxu1 }
 0x1c6   :  { %v286_v4 = vadd.f32 %v285_v3, %v242_v2  ;;  %v490_v5 = vpop.f32.mrb[3].mxu1  ;;  %v289_v6 = vmax.f32 %v283_v0, 0.0 }
 0x1c8   :  { %v290_v7 = vmax.f32 %v286_v4, 0.0 }
 0x1ca   :  { %v499_v8 = vpack.c.bf16 %v290_v7, %v289_v6 }
 0x1cc   :  { %500 = vmatpush3.bf16.msra.mxu0 %v499_v8 }
 0x1cf   :  { %496 = vmatmul.mubr.msk.f32.vlgmr.msra.gmra.mrb[8].mxu0 %vm298_vm3, %v291_v9 }
 0x2a2   :  { %v368_v12 = vpop.f32.mrb[8].mxu0 }
 0x2a3   :  { %v369_v13 = vadd.f32 %v368_v12, %v296_v11  ;;  %v497_v15 = vpop.f32.mrb[9].mxu0 }
 0x2a5   :  { %v373_v16 = vrot.slane %v369_v13, 1  ;;  %v376_v18 = vrot.slane %v369_v13, 2 }
 0x2a7   :  { %v375_v17 = vmax.f32 %v369_v13, %v373_v16 }
 0x2a9   :  { %v378_v20 = vmax.f32 %v375_v17, %v376_v18 }
 0x2ab   :  { %v382_v21 = vrot.slane %v378_v20, %v381_v19 }
 0x2ad   :  { %v383_v22 = vsub.f32 %v369_v13, %v382_v21 }
 0x2af   :  { %v384_v23 = vmul.f32 1.442695, %v383_v22 }
 0x2b1   :  { %507 = vpow2.f32 %v384_v23 }
 0x2bb   :  { %v508_v24 = vpop.eup %507 }
 0x2bc   :  { %v387_v25 = vrot.slane %v508_v24, 1  ;;  %v390_v27 = vrot.slane %v508_v24, 2 }
 0x2be   :  { %v389_v26 = vadd.f32 %v508_v24, %v387_v25 }
 0x2c0   :  { %v392_v28 = vadd.f32 %v390_v27, %v389_v26 }
 0x2c2   :  { %v396_v29 = vrot.slane %v392_v28, %v381_v19 }
 0x2c4   :  { %509 = vrcp.f32 %v396_v29 }
 0x2ce   :  { %v510_v30 = vpop.eup %509 }
 0x2cf   :  { %v398_v31 = vmul.f32 %v510_v30, %v508_v24 }
 0x2d1   :  { %399 = vxpose.xlu1.b32.start.end [1/1] (short) (narrow) %v398_v31, 8 }
 0x351   :  { %v415_v32 = vpop.trf.xlu1 }
 0x352   :  { %432 = vst.msk [vmem:[%s644_s7] sm:$0xff] %vm431_vm4, %v415_v32 }

</bundles_post_ra>
